<compile_context>
chip_gen: v7x
topology: tpu7x:2x2x1
jax: 0.10.0
libtpu: 0.0.40
codegen_flags: <defaults>
</compile_context>

<pallas_src>
import functools

import jax
import jax.numpy as jnp
from jax import lax
from jax.experimental import pallas as pl
from jax.experimental.pallas import tpu as pltpu

n_embd = 32
_LANES = 128


def _ffwd_kernel(x_ref, w_ref, b_ref, o_ref):
    # x_ref: (TM, L) packed tokens; w_ref: (L, L) block-diagonal weight kept in
    # PyTorch (out, in) layout; b_ref: (1, L) packed bias.
    y = lax.dot_general(
        x_ref[...], w_ref[...],
        dimension_numbers=(((1,), (1,)), ((), ())),   # contract x lanes vs w `in`
        preferred_element_type=jnp.float32)
    y = y + b_ref[...].astype(jnp.float32)
    o_ref[...] = jnp.maximum(y, 0.0).astype(o_ref.dtype)


@functools.partial(jax.jit, static_argnames=("block_m",))
def feed_forward(x, weight, bias, *, block_m=512):
    """x: (B, T, C); weight: (C, C) in PyTorch (out, in) layout; bias: (C,)."""
    B, T, C = x.shape
    M = B * T

    # Pack P tokens per row so the kernel's last dim is a full 128 lanes.
    if C < _LANES and _LANES % C == 0:
        P = _LANES // C
    else:
        P = 1                      # C already >= 128 (or awkward): no packing
    L = P * C

    # --- pack tokens -------------------------------------------------------
    x2d = x.reshape(M, C)
    m_pad = -M % P
    if m_pad:
        x2d = jnp.pad(x2d, ((0, m_pad), (0, 0)))
    Mp = (M + m_pad) // P
    x_packed = x2d.reshape(Mp, L)

    # Tile packed rows; TM is either a multiple of 8 (block_m=512 default,
    # 85%+ of HBM roofline on v6e) or the full (padded) row dim for tiny M.
    TM = block_m if Mp >= block_m else Mp
    row_pad = -Mp % TM
    if row_pad:
        x_packed = jnp.pad(x_packed, ((0, row_pad), (0, 0)))
    Mp_padded = Mp + row_pad

    # Block-diagonal weight, still (out, in) layout; tiny (128x128) for C=32.
    if P > 1:
        w_packed = jnp.kron(jnp.eye(P, dtype=weight.dtype), weight)
        b_packed = jnp.tile(bias, (P,)).reshape(1, L)
    else:
        w_packed = weight
        b_packed = bias.reshape(1, L)

    out_packed = pl.pallas_call(
        _ffwd_kernel,
        out_shape=jax.ShapeDtypeStruct((Mp_padded, L), x.dtype),
        grid_spec=pltpu.PrefetchScalarGridSpec(
            num_scalar_prefetch=0,
            grid=(Mp_padded // TM,),
            in_specs=[
                pl.BlockSpec((TM, L), lambda i: (i, 0)),   # x: tiled over rows
                pl.BlockSpec((L, L), lambda i: (0, 0)),    # weight: resident
                pl.BlockSpec((1, L), lambda i: (0, 0)),    # bias: resident
            ],
            out_specs=pl.BlockSpec((TM, L), lambda i: (i, 0)),
        ),
        compiler_params=pltpu.CompilerParams(
            dimension_semantics=("parallel",)),
    )(x_packed, w_packed, b_packed)

    # --- unpack ------------------------------------------------------------
    out2d = out_packed[:Mp].reshape(Mp * P, C)[:M]
    return out2d.reshape(B, T, C)


def feed_forward_ref(x, weight, bias):
    return jnp.maximum(jnp.einsum("btc,oc->bto", x, weight) + bias, 0.0)


if __name__ == "__main__":
    key = jax.random.PRNGKey(0)
    kx, kw, kb = jax.random.split(key, 3)

    B, T, C = 2, 8, n_embd
    x = jax.random.normal(kx, (B, T, C), dtype=jnp.float32)
    # Deterministic "Linear" parameters (PyTorch layout: (out_features, in_features)).
    bound = 1.0 / (C ** 0.5)
    weight = jax.random.uniform(kw, (C, C), minval=-bound, maxval=bound,
                                dtype=jnp.float32)
    bias = jax.random.uniform(kb, (C,), minval=-bound, maxval=bound,
                              dtype=jnp.float32)

    out = feed_forward(x, weight, bias)
    out = jax.block_until_ready(out)

    ref = feed_forward_ref(x, weight, bias)
    assert out.shape == (B, T, C)
    assert jnp.allclose(out, ref, atol=1e-5, rtol=1e-5)

    print("KERNEL_OK")
</pallas_src>

<mosaic_0001>
module attributes {stable_mosaic.version = 11 : i64} {
  func.func @_ffwd_kernel(%arg0: i32, %arg1: memref<4x128xf32, #tpu.memory_space<vmem>>, %arg2: memref<128x128xf32, #tpu.memory_space<vmem>>, %arg3: memref<1x128xf32, #tpu.memory_space<vmem>>, %arg4: memref<4x128xf32, #tpu.memory_space<vmem>>) attributes {dimension_semantics = [#tpu.dimension_semantics<parallel>], iteration_bounds = array<i64: 1>, scalar_prefetch = 0 : i64, scratch_operands = 0 : i64, tpu.core_type = #tpu.core_type<tc>, window_params = [{transform_indices = @transform_0, window_bounds = array<i64: 4, 128>}, {pipeline_mode = #tpu.pipeline_mode<synchronous>, transform_indices = @transform_1, window_bounds = array<i64: 128, 128>}, {pipeline_mode = #tpu.pipeline_mode<synchronous>, transform_indices = @transform_2, window_bounds = array<i64: 1, 128>}, {transform_indices = @transform_3, window_bounds = array<i64: 4, 128>}]} {
    %c0 = arith.constant 0 : index
    %c0_0 = arith.constant 0 : index
    %0 = vector.load %arg1[%c0, %c0_0] : memref<4x128xf32, #tpu.memory_space<vmem>>, vector<4x128xf32>
    %c0_1 = arith.constant 0 : index
    %c0_2 = arith.constant 0 : index
    %1 = vector.load %arg2[%c0_1, %c0_2] : memref<128x128xf32, #tpu.memory_space<vmem>>, vector<128x128xf32>
    %cst = arith.constant dense<0.000000e+00> : vector<4x128xf32>
    %2 = tpu.matmul %0, %1, %cst {dimension_numbers = #tpu.dot_dimension_numbers<[1], [1], [0], [0], [0, 0, 1, 0], [], []>} : vector<4x128xf32>, vector<128x128xf32>, vector<4x128xf32> -> vector<4x128xf32>
    %c0_3 = arith.constant 0 : index
    %c0_4 = arith.constant 0 : index
    %3 = vector.load %arg3[%c0_3, %c0_4] : memref<1x128xf32, #tpu.memory_space<vmem>>, vector<1x128xf32>
    %4 = vector.broadcast %3 : vector<1x128xf32> to vector<4x128xf32>
    %5 = arith.addf %2, %4 : vector<4x128xf32>
    %cst_5 = arith.constant 0.000000e+00 : f32
    %6 = vector.broadcast %cst_5 : f32 to vector<4x128xf32>
    %7 = arith.maximumf %5, %6 : vector<4x128xf32>
    %c0_6 = arith.constant 0 : index
    %c0_7 = arith.constant 0 : index
    %8 = vector.load %arg4[%c0_6, %c0_7] : memref<4x128xf32, #tpu.memory_space<vmem>>, vector<4x128xf32>
    tpu.vector_store %arg4[%c0_6, %c0_7], %7 {strides = array<i32>} : memref<4x128xf32, #tpu.memory_space<vmem>>, vector<4x128xf32>,
    return
  }
  func.func @transform_0(%arg0: i32) -> (i32, i32) {
    %c0_i32 = arith.constant 0 : i32
    %c0_i32_0 = arith.constant 0 : i32
    return %arg0, %c0_i32 : i32, i32
  }
  func.func @transform_1(%arg0: i32) -> (i32, i32) {
    %c0_i32 = arith.constant 0 : i32
    %c0_i32_0 = arith.constant 0 : i32
    %c0_i32_1 = arith.constant 0 : i32
    return %c0_i32, %c0_i32_0 : i32, i32
  }
  func.func @transform_2(%arg0: i32) -> (i32, i32) {
    %c0_i32 = arith.constant 0 : i32
    %c0_i32_0 = arith.constant 0 : i32
    %c0_i32_1 = arith.constant 0 : i32
    return %c0_i32, %c0_i32_0 : i32, i32
  }
  func.func @transform_3(%arg0: i32) -> (i32, i32) {
    %c0_i32 = arith.constant 0 : i32
    %c0_i32_0 = arith.constant 0 : i32
    return %arg0, %c0_i32 : i32, i32
  }
}

</mosaic_0001>

<bundles_post_ra>
// kernel: tile.8
= control target key start
LH: loop header
LB: loop body
LE: loop exit
PB: predicated region body
PF: predicated region fallthrough
CT: control target
= control target key end

     0   :  { %s22_s0 = inlined_call_operand.vmem [shape: f32[32], index: 0, kind: input, shape index: {}]   ;;  %s23_s1 = inlined_call_operand.vmem [shape: f32[4,32], index: 1, kind: output, shape index: {}]  }
   0x1   :  { %v4_v0 = vld [vmem:[%s22_s0] ss:$0 sm:$0xff] }
   0x2   :  { %5 = vst [vmem:[%s23_s1] sm:$0xf] %v4_v0 }

// kernel: tile.9
= control target key start
LH: loop header
LB: loop body
LE: loop exit
PB: predicated region body
PF: predicated region fallthrough
CT: control target
= control target key end

     0   :  { %vm7_vm0 = vcmask 261120   ;;  %s37_s8 = smov 32   ;;  %s38_s9 = smov 64   ;;  %vm13_vm1 = vcmask 1048320   ;;  %vm19_vm2 = vcmask 785920   ;;  %vm25_vm3 = vcmask 523520   ;;  %s55_s0 = inlined_call_operand.vmem [shape: f32[4,32], index: 0, kind: input, shape index: {}]   ;;  %s56_s1 = inlined_call_operand.vmem [shape: f32[1,128], index: 1, kind: output, shape index: {}]  }
   0x1   :  { %v4_v0 = vld [vmem:[%s55_s0] sm:$0xf]  ;;  %s36_s0 = smov 96  }
   0x2   :  { %5 = vst [vmem:[#allocation1] sm:$0xf] %v4_v0 }
   0x9   :  { %v10_v1 = vld [vmem:[#allocation1 + $0x3] sm:$0x1]   ;;  %v22_v2 = vld [vmem:[#allocation1 + $0x1] sm:$0x1]   ;;  %v6_v3 = vld [vmem:[#allocation1] sm:$0x1]  }
   0xa   :  { %11 = vrot.lane.b32.xlu0 %v10_v1, %s36_s0  ;;  %23 = vrot.lane.b32.xlu1 %v22_v2, %s37_s8  ;;  %v16_v4 = vld [vmem:[#allocation1 + $0x2] sm:$0x1]   ;;  %8 = vst.msk [vmem:[#allocation0] sm:$0x1] %vm7_vm0, %v6_v3  }
   0xe   :  { %17 = vrot.lane.b32.xlu0 %v16_v4, %s38_s9 }
  0x7c   :  { %v12_v5 = vpop.permute.xlu0 %11   ;;  %v24_v6 = vpop.permute.xlu1 %23  }
  0x7d   :  { %14 = vst.msk [vmem:[#allocation0] sm:$0x1] %vm13_vm1, %v12_v5  }
  0x80   :  { %v18_v7 = vpop.permute.xlu0 %17  }
  0x81   :  { %20 = vst.msk [vmem:[#allocation0] sm:$0x1] %vm19_vm2, %v18_v7  }
  0x82   :  { %26 = vst.msk [vmem:[#allocation0] sm:$0x1] %vm25_vm3, %v24_v6  }
  0x89   :  { %v30_v8 = vld [vmem:[#allocation0] sm:$0x1] }
  0x8a   :  { %32 = vst [vmem:[%s56_s1] sm:$0x1] %v30_v8 }

// kernel: feed_forward.1
= control target key start
LH: loop header
LB: loop body
LE: loop exit
PB: predicated region body
PF: predicated region fallthrough
CT: control target
= control target key end

     0   :  { %v194_v0 = vmov 0.0|0.0   ;;  %vm195_vm0 = vmmov 0   ;;  %v196_v3 = vmov 0.0   ;;  %s274_s1 = inlined_call_operand.vmem [shape: f32[128,128], index: 1, kind: input, shape index: {}]   ;;  %s275_s0 = inlined_call_operand.vmem [shape: f32[4,128], index: 0, kind: input, shape index: {}]   ;;  %s276_s2 = inlined_call_operand.vmem [shape: f32[1,128], index: 2, kind: input, shape index: {}]   ;;  %s277_s3 = inlined_call_operand.vmem [shape: f32[4,128], index: 3, kind: output, shape index: {}]  }
   0x1   :  { %167 = vmatprep.subr.bf16.mxu0 %v194_v0  ;;  %v15_v1 = vld [vmem:[%s274_s1] sm:$0xff]  ;;  %v16_v2 = vld [vmem:[%s274_s1 + $0x8] sm:$0xff]  ;;  %164 = vmatprep.mubr.msk.f32.mxu0 %vm195_vm0, %v196_v3  ;;  %v17_v5 = vld [vmem:[%s274_s1 + $0x10] sm:$0xff] }
   0x2   :  { %v168_v4 = vpack.c.bf16 %v16_v2, %v15_v1  ;;  %v18_v6 = vld [vmem:[%s274_s1 + $0x18] sm:$0xff]  ;;  %v19_v8 = vld [vmem:[%s274_s1 + $0x20] sm:$0xff]  ;;  %v20_v9 = vld [vmem:[%s274_s1 + $0x28] sm:$0xff] }
   0x3   :  { %v171_v7 = vpack.c.bf16 %v18_v6, %v17_v5  ;;  %v174_v10 = vpack.c.bf16 %v20_v9, %v19_v8  ;;  %v21_v11 = vld [vmem:[%s274_s1 + $0x30] sm:$0xff]  ;;  %v22_v12 = vld [vmem:[%s274_s1 + $0x38] sm:$0xff]  ;;  %v23_v14 = vld [vmem:[%s274_s1 + $0x40] sm:$0xff] }
   0x4   :  { %169 = vmatpush3.bf16.xpose.msra.mxu0 %v168_v4  ;;  %v177_v13 = vpack.c.bf16 %v22_v12, %v21_v11  ;;  %v24_v15 = vld [vmem:[%s274_s1 + $0x48] sm:$0xff]  ;;  %v25_v17 = vld [vmem:[%s274_s1 + $0x50] sm:$0xff]  ;;  %v26_v18 = vld [vmem:[%s274_s1 + $0x58] sm:$0xff] }
   0x5   :  { %170 = vmatprep.subr.bf16.mxu0 %v194_v0  ;;  %v180_v16 = vpack.c.bf16 %v24_v15, %v23_v14  ;;  %v183_v19 = vpack.c.bf16 %v26_v18, %v25_v17  ;;  %v27_v20 = vld [vmem:[%s274_s1 + $0x60] sm:$0xff]  ;;  %v28_v21 = vld [vmem:[%s274_s1 + $0x68] sm:$0xff]  ;;  %v29_v23 = vld [vmem:[%s274_s1 + $0x70] sm:$0xff] }
   0x6   :  { %v186_v22 = vpack.c.bf16 %v28_v21, %v27_v20  ;;  %v30_v24 = vld [vmem:[%s274_s1 + $0x78] sm:$0xff]  ;;  %v14_v26 = vld [vmem:[%s275_s0] sm:$0xf] }
   0x7   :  { %v189_v25 = vpack.c.bf16 %v30_v24, %v29_v23  ;;  %v114_v27 = vld [vmem:[%s276_s2] ss:$0 sm:$0xff] }
   0xc   :  { %172 = vmatpush3.bf16.xpose.msra.mxu0 %v171_v7 }
   0xd   :  { %173 = vmatprep.subr.bf16.mxu0 %v194_v0 }
  0x14   :  { %175 = vmatpush3.bf16.xpose.msra.mxu0 %v174_v10 }
  0x15   :  { %176 = vmatprep.subr.bf16.mxu0 %v194_v0 }
  0x1c   :  { %178 = vmatpush3.bf16.xpose.msra.mxu0 %v177_v13 }
  0x1d   :  { %179 = vmatprep.subr.bf16.mxu0 %v194_v0 }
  0x24   :  { %181 = vmatpush3.bf16.xpose.msra.mxu0 %v180_v16 }
  0x25   :  { %182 = vmatprep.subr.bf16.mxu0 %v194_v0 }
  0x2c   :  { %184 = vmatpush3.bf16.xpose.msra.mxu0 %v183_v19 }
  0x2d   :  { %185 = vmatprep.subr.bf16.mxu0 %v194_v0 }
  0x34   :  { %187 = vmatpush3.bf16.xpose.msra.mxu0 %v186_v22 }
  0x35   :  { %188 = vmatprep.subr.bf16.mxu0 %v194_v0 }
  0x3c   :  { %190 = vmatpush3.bf16.xpose.msra.mxu0 %v189_v25 }
  0x43   :  { %165 = vmatmul.mubr.f32.vlgmr.msra.gmra.mrb[0].mxu0 %v14_v26 }
 0x116   :  { %v104_v28 = vpop.f32.mrb[0].mxu0 }
 0x117   :  { %v105_v29 = vadd.f32 %v114_v27, %v104_v28  ;;  %v166_v30 = vpop.f32.mrb[1].mxu0 }
 0x119   :  { %v108_v31 = vmax.f32 %v105_v29, 0.0 }
 0x11b   :  { %109 = vst [vmem:[%s277_s3] sm:$0xf] %v108_v31 }

</bundles_post_ra>
